<compile_context>
chip_gen: v6e
topology: v6e:2x2x1
jax: 0.10.0
libtpu: 0.0.40
codegen_flags: <defaults>
</compile_context>

<pallas_src>
import math

import jax
import jax.numpy as jnp
from jax.experimental import pallas as pl
from jax.experimental.pallas import tpu as pltpu

_LANE = 128
_SUBLANE = 8


def _round_up(n, m):
    return ((n + m - 1) // m) * m


def _vmem_tile_bytes(rows, cols, dtype):
    # Upper bound on one buffer's VMEM footprint after Mosaic (sublane, lane)
    # tiling: rows -> multiple of 16 (covers packed bf16), cols -> multiple of 128.
    return _round_up(rows, 16) * _round_up(cols, _LANE) * jnp.dtype(dtype).itemsize


# ----------------------------------------------------------------------------
# Kernel
# ----------------------------------------------------------------------------
def qnet_kernel(x_ref, w1_ref, b1_ref, w2_ref, b2_ref, o_ref):
    # Cast the streamed x tile to the weight dtype *in VMEM/vregs* (free; keeps
    # the MXU on its native bf16 path when weights are bf16).
    x = x_ref[...].astype(w1_ref.dtype)
    # Hidden layer: relu(x @ W1 + b1); accumulate in f32 on the MXU, epilogue
    # stays f32 (VPU-friendly on every chip generation).
    h = jnp.dot(x, w1_ref[...], preferred_element_type=jnp.float32)
    h = jnp.maximum(h + b1_ref[...], 0.0)
    # Output layer: relu(h @ W2 + b2)  (ReLU after the last Linear per module).
    o = jnp.dot(h.astype(w2_ref.dtype), w2_ref[...],
                preferred_element_type=jnp.float32)
    o = jnp.maximum(o + b2_ref[...], 0.0)
    o_ref[...] = o.astype(o_ref.dtype)


# ----------------------------------------------------------------------------
# One-time parameter preparation (hoisted out of the per-call hot path)
# ----------------------------------------------------------------------------
def prepare_params(w1, b1, w2, b2, compute_dtype=jnp.bfloat16):
    """Cast weights once to the streaming/MXU dtype; biases stay f32 rows.

    w1: (S, H), w2: (H, A)  -- stored as (in, out), i.e. torch weight.T.
    """
    return dict(
        w1=jnp.asarray(w1, compute_dtype),
        b1=jnp.asarray(b1, jnp.float32).reshape(1, -1),
        w2=jnp.asarray(w2, compute_dtype),
        b2=jnp.asarray(b2, jnp.float32).reshape(1, -1),
    )


# ----------------------------------------------------------------------------
# Forward wrapper
# ----------------------------------------------------------------------------
def qnetwork_forward(x, params, *, block_b=2048):
    """Fused MLP forward.  x: (B, S) state batch, params from prepare_params."""
    w1, b1, w2, b2 = params["w1"], params["b1"], params["w2"], params["b2"]
    B, S = x.shape
    H = w1.shape[1]
    A = w2.shape[1]
    out_dtype = x.dtype

    # Divisor-aware batch tile (multiple of 8) -> near-zero row padding while
    # keeping the per-step grid overhead amortised.
    B8 = _round_up(B, _SUBLANE)
    n_steps = pl.cdiv(B8, block_b)
    TB = _round_up(pl.cdiv(B8, n_steps), _SUBLANE)
    # v7x megacore: force >= 2 grid steps when the batch is big enough so
    # dimension_semantics=("parallel",) shards the batch across both TCs.
    if n_steps == 1:
        half = _round_up(pl.cdiv(B8, 2), _SUBLANE)
        if half >= 256:
            TB, n_steps = half, 2
    B_p = TB * n_steps

    # Row-only padding (no lane padding); usually B_p == B for typical batches.
    x_p = x if B_p == B else jnp.pad(x, ((0, B_p - B), (0, 0)))

    # VMEM budget: double-buffered x / out tiles, resident weights/biases,
    # f32 intermediates; capped well under v7x's 64 MiB physical VMEM.
    vmem_est = (
        2 * _vmem_tile_bytes(TB, S, x.dtype)            # x tiles (pipelined)
        + 2 * _vmem_tile_bytes(TB, A, out_dtype)        # out tiles (pipelined)
        + 2 * (_vmem_tile_bytes(S, H, w1.dtype)
               + _vmem_tile_bytes(H, A, w2.dtype))      # resident weights
        + 2 * (_vmem_tile_bytes(1, H, jnp.float32)
               + _vmem_tile_bytes(1, A, jnp.float32))   # biases
        + _vmem_tile_bytes(TB, H, jnp.float32)          # hidden activations
        + _vmem_tile_bytes(TB, A, jnp.float32)          # pre-store output
    )
    vmem_limit = int(min(max(2 * vmem_est, 8 << 20), 40 << 20))

    out = pl.pallas_call(
        qnet_kernel,
        out_shape=jax.ShapeDtypeStruct((B_p, A), out_dtype),
        grid=(n_steps,),
        in_specs=[
            # Streamed per grid step; last dim == full dim (no lane padding).
            pl.BlockSpec((TB, S), lambda i: (i, 0)),
            # Tiny weights/biases pinned at block (0, 0): DMA'd once, stay
            # VMEM-resident across all grid steps.
            pl.BlockSpec((S, H), lambda i: (0, 0)),
            pl.BlockSpec((1, H), lambda i: (0, 0)),
            pl.BlockSpec((H, A), lambda i: (0, 0)),
            pl.BlockSpec((1, A), lambda i: (0, 0)),
        ],
        # Unpadded output block (A == full dim): 16x fewer bytes than a
        # lane-padded slab, and no wrapper-side column slice.
        out_specs=pl.BlockSpec((TB, A), lambda i: (i, 0)),
        compiler_params=pltpu.CompilerParams(
            dimension_semantics=("parallel",),   # megacore split on v7x
            vmem_limit_bytes=vmem_limit,
        ),
    )(x_p, w1, b1, w2, b2)

    return out if B_p == B else out[:B]


# ----------------------------------------------------------------------------
# Reference / init helpers
# ----------------------------------------------------------------------------
def init_linear(key, fan_in, fan_out, dtype=jnp.float32):
    """PyTorch-style nn.Linear init: U(-1/sqrt(fan_in), 1/sqrt(fan_in))."""
    kw, kb = jax.random.split(key)
    bound = 1.0 / math.sqrt(fan_in)
    w = jax.random.uniform(kw, (fan_in, fan_out), dtype, -bound, bound)  # = torch weight.T
    b = jax.random.uniform(kb, (fan_out,), dtype, -bound, bound)
    return w, b


def reference_forward(x, w1, b1, w2, b2):
    h = jnp.maximum(x @ w1 + b1, 0.0)
    return jnp.maximum(h @ w2 + b2, 0.0)


if __name__ == "__main__":
    # Small shapes consistent with the module defaults (lin_features=64).
    batch = 8
    state_size = 16
    hidden = 64
    action_size = 8

    key = jax.random.PRNGKey(0)
    kx, k1, k2 = jax.random.split(key, 3)

    x = jax.random.normal(kx, (batch, state_size), jnp.float32)
    w1, b1 = init_linear(k1, state_size, hidden)
    w2, b2 = init_linear(k2, hidden, action_size)

    ref = reference_forward(x, w1, b1, w2, b2)

    # f32 weight path: strict check.
    params_f32 = prepare_params(w1, b1, w2, b2, compute_dtype=jnp.float32)
    out_f32 = jax.block_until_ready(qnetwork_forward(x, params_f32))
    assert out_f32.shape == (batch, action_size)
    assert jnp.allclose(out_f32, ref, atol=1e-5, rtol=1e-5), "f32 mismatch vs reference"

    # Default bf16 weight streaming (memory-bound kernel): loose check.
    params_bf16 = prepare_params(w1, b1, w2, b2)
    out_bf16 = jax.block_until_ready(qnetwork_forward(x, params_bf16))
    assert out_bf16.shape == (batch, action_size)
    assert jnp.allclose(out_bf16, ref, atol=5e-2, rtol=5e-2), "bf16 mismatch vs reference"

    # Ragged batch (exercises divisor-aware tiling + row pad/slice path).
    xr = jax.random.normal(kx, (13, state_size), jnp.float32)
    out_r = jax.block_until_ready(qnetwork_forward(xr, params_f32))
    assert out_r.shape == (13, action_size)
    assert jnp.allclose(out_r, reference_forward(xr, w1, b1, w2, b2),
                        atol=1e-5, rtol=1e-5), "ragged-batch mismatch vs reference"

    print("KERNEL_OK")
</pallas_src>

<mosaic_0001>
module attributes {stable_mosaic.version = 11 : i64} {
  func.func @qnet_kernel(%arg0: i32, %arg1: memref<8x16xf32, #tpu.memory_space<vmem>>, %arg2: memref<16x64xf32, #tpu.memory_space<vmem>>, %arg3: memref<1x64xf32, #tpu.memory_space<vmem>>, %arg4: memref<64x8xf32, #tpu.memory_space<vmem>>, %arg5: memref<1x8xf32, #tpu.memory_space<vmem>>, %arg6: memref<8x8xf32, #tpu.memory_space<vmem>>) attributes {dimension_semantics = [#tpu.dimension_semantics<parallel>], iteration_bounds = array<i64: 1>, scalar_prefetch = 0 : i64, scratch_operands = 0 : i64, tpu.core_type = #tpu.core_type<tc>, window_params = [{transform_indices = @transform_0, window_bounds = array<i64: 8, 16>}, {pipeline_mode = #tpu.pipeline_mode<synchronous>, transform_indices = @transform_1, window_bounds = array<i64: 16, 64>}, {pipeline_mode = #tpu.pipeline_mode<synchronous>, transform_indices = @transform_2, window_bounds = array<i64: 1, 64>}, {pipeline_mode = #tpu.pipeline_mode<synchronous>, transform_indices = @transform_3, window_bounds = array<i64: 64, 8>}, {pipeline_mode = #tpu.pipeline_mode<synchronous>, transform_indices = @transform_4, window_bounds = array<i64: 1, 8>}, {transform_indices = @transform_5, window_bounds = array<i64: 8, 8>}]} {
    %c0 = arith.constant 0 : index
    %c0_0 = arith.constant 0 : index
    %0 = vector.load %arg1[%c0, %c0_0] : memref<8x16xf32, #tpu.memory_space<vmem>>, vector<8x16xf32>
    %c0_1 = arith.constant 0 : index
    %c0_2 = arith.constant 0 : index
    %1 = vector.load %arg2[%c0_1, %c0_2] : memref<16x64xf32, #tpu.memory_space<vmem>>, vector<16x64xf32>
    %cst = arith.constant dense<0.000000e+00> : vector<8x64xf32>
    %2 = tpu.matmul %0, %1, %cst {dimension_numbers = #tpu.dot_dimension_numbers<[1], [0], [0], [1], [0, 0, 1, 1], [], []>} : vector<8x16xf32>, vector<16x64xf32>, vector<8x64xf32> -> vector<8x64xf32>
    %c0_3 = arith.constant 0 : index
    %c0_4 = arith.constant 0 : index
    %3 = vector.load %arg3[%c0_3, %c0_4] : memref<1x64xf32, #tpu.memory_space<vmem>>, vector<1x64xf32>
    %4 = vector.broadcast %3 : vector<1x64xf32> to vector<8x64xf32>
    %5 = arith.addf %2, %4 : vector<8x64xf32>
    %cst_5 = arith.constant 0.000000e+00 : f32
    %6 = vector.broadcast %cst_5 : f32 to vector<8x64xf32>
    %7 = arith.maximumf %5, %6 : vector<8x64xf32>
    %c0_6 = arith.constant 0 : index
    %c0_7 = arith.constant 0 : index
    %8 = vector.load %arg4[%c0_6, %c0_7] : memref<64x8xf32, #tpu.memory_space<vmem>>, vector<64x8xf32>
    %cst_8 = arith.constant dense<0.000000e+00> : vector<8x8xf32>
    %9 = tpu.matmul %7, %8, %cst_8 {dimension_numbers = #tpu.dot_dimension_numbers<[1], [0], [0], [1], [0, 0, 1, 1], [], []>} : vector<8x64xf32>, vector<64x8xf32>, vector<8x8xf32> -> vector<8x8xf32>
    %c0_9 = arith.constant 0 : index
    %c0_10 = arith.constant 0 : index
    %10 = vector.load %arg5[%c0_9, %c0_10] : memref<1x8xf32, #tpu.memory_space<vmem>>, vector<1x8xf32>
    %11 = vector.broadcast %10 : vector<1x8xf32> to vector<8x8xf32>
    %12 = arith.addf %9, %11 : vector<8x8xf32>
    %cst_11 = arith.constant 0.000000e+00 : f32
    %13 = vector.broadcast %cst_11 : f32 to vector<8x8xf32>
    %14 = arith.maximumf %12, %13 : vector<8x8xf32>
    %c0_12 = arith.constant 0 : index
    %c0_13 = arith.constant 0 : index
    %15 = vector.load %arg6[%c0_12, %c0_13] : memref<8x8xf32, #tpu.memory_space<vmem>>, vector<8x8xf32>
    tpu.vector_store %arg6[%c0_12, %c0_13], %14 {strides = array<i32>} : memref<8x8xf32, #tpu.memory_space<vmem>>, vector<8x8xf32>,
    return
  }
  func.func @transform_0(%arg0: i32) -> (i32, i32) {
    %c0_i32 = arith.constant 0 : i32
    %c0_i32_0 = arith.constant 0 : i32
    return %arg0, %c0_i32 : i32, i32
  }
  func.func @transform_1(%arg0: i32) -> (i32, i32) {
    %c0_i32 = arith.constant 0 : i32
    %c0_i32_0 = arith.constant 0 : i32
    %c0_i32_1 = arith.constant 0 : i32
    return %c0_i32, %c0_i32_0 : i32, i32
  }
  func.func @transform_2(%arg0: i32) -> (i32, i32) {
    %c0_i32 = arith.constant 0 : i32
    %c0_i32_0 = arith.constant 0 : i32
    %c0_i32_1 = arith.constant 0 : i32
    return %c0_i32, %c0_i32_0 : i32, i32
  }
  func.func @transform_3(%arg0: i32) -> (i32, i32) {
    %c0_i32 = arith.constant 0 : i32
    %c0_i32_0 = arith.constant 0 : i32
    %c0_i32_1 = arith.constant 0 : i32
    return %c0_i32, %c0_i32_0 : i32, i32
  }
  func.func @transform_4(%arg0: i32) -> (i32, i32) {
    %c0_i32 = arith.constant 0 : i32
    %c0_i32_0 = arith.constant 0 : i32
    %c0_i32_1 = arith.constant 0 : i32
    return %c0_i32, %c0_i32_0 : i32, i32
  }
  func.func @transform_5(%arg0: i32) -> (i32, i32) {
    %c0_i32 = arith.constant 0 : i32
    %c0_i32_0 = arith.constant 0 : i32
    return %arg0, %c0_i32 : i32, i32
  }
}

</mosaic_0001>

<bundles_post_ra>
// kernel: tpu_custom_call.1
= control target key start
LH: loop header
LB: loop body
LE: loop exit
PB: predicated region body
PF: predicated region fallthrough
CT: control target
= control target key end

     0   :  { %v279_v1 = vmov 0.0   ;;  %vm280_vm0 = vmmov 0   ;;  %vm31_vm1 = vcmask 130048   ;;  %s356_s0 = inlined_call_operand.vmem [shape: f32[8,16], index: 0, kind: input, shape index: {}]   ;;  %s357_s1 = inlined_call_operand.vmem [shape: f32[16,64], index: 1, kind: input, shape index: {}]   ;;  %s358_s2 = inlined_call_operand.vmem [shape: f32[1,64], index: 2, kind: input, shape index: {}]   ;;  %s359_s3 = inlined_call_operand.vmem [shape: f32[64,8], index: 3, kind: input, shape index: {}]   ;;  %s360_s4 = inlined_call_operand.vmem [shape: f32[1,8], index: 4, kind: input, shape index: {}]   ;;  %s361_s5 = inlined_call_operand.hbm [shape: f32[8,8], index: 5, kind: output, shape index: {}]  }
   0x1   :  { %v23_v0 = vld [vmem:[%s357_s1 + $0x8] sm:$0xff]  ;;  %228 = vmatprep.subr.mxu0 %v279_v1  ;;  %v22_v2 = vld [vmem:[%s357_s1] sm:$0xff]  ;;  %232 = vmatprep.mubr.msk.f32.mxu0 %vm280_vm0, %v279_v1  ;;  %v113_v3 = vld [vmem:[%s359_s3 + $0x38] sm:$0xff] }
   0x2   :  { %229 = vmatpush3.msra.mxu0 %v23_v0  ;;  %v21_v4 = vld [vmem:[%s356_s0] sm:$0xff]  ;;  %235 = vmatprep.subr.mxu1 %v279_v1  ;;  %v112_v5 = vld [vmem:[%s359_s3 + $0x30] sm:$0xff] }
   0x3   :  { %230 = vmatprep.subr.mxu0 %v279_v1  ;;  %236 = vmatpush3.msra.mxu1 %v113_v3 }
   0x4   :  { %10 = vsyncpa [#allocation3], 0  ;;  %231 = vmatpush3.msra.mxu0 %v22_v2  ;;  %237 = vmatprep.subr.mxu1 %v279_v1  ;;  %v111_v6 = vld [vmem:[%s359_s3 + $0x28] sm:$0xff]  ;;  %v110_v7 = vld [vmem:[%s359_s3 + $0x20] sm:$0xff]  ;;  %vm121_vm2 = vcmask 523264   ;;  %s281_s17 = smov [#allocation2]  }
   0x5   :  { %233 = vmatmul.mubr.msk.f32.vlgmr.msra.gmra.mxu0 %vm31_vm1, %v21_v4  ;;  %238 = vmatpush3.msra.mxu1 %v112_v5  ;;  %v109_v8 = vld [vmem:[%s359_s3 + $0x18] sm:$0xff]  ;;  %v108_v9 = vld [vmem:[%s359_s3 + $0x10] sm:$0xff]  ;;  %v107_v10 = vld [vmem:[%s359_s3 + $0x8] sm:$0xff]  ;;  %s204_s18 = sshll.u32 %s281_s17, 4  ;;  %vm196_vm3 = vcmask 64512   ;;  %s205_s18 = int_to_ptr.vmem [resolvable:$true] %s204_s18 }
   0x6   :  { %239 = vmatprep.subr.mxu1 %v279_v1  ;;  %251 = vmatprep.mubr.msk.f32.mxu1 %vm280_vm0, %v279_v1  ;;  %v106_v11 = vld [vmem:[%s359_s3] sm:$0xff]  ;;  %p262_p1 = scmp.lt.s32.totalorder %s205_s18, %s205_s18 }
   0x7   :  { %240 = vmatpush3.msra.mxu1 %v111_v6  ;;  %v212_v12 = vld [vmem:[%s358_s2] ss:$0 sm:$0xff]  ;;  %s257_s2 = scalar_lea.vmem %s205_s18, 128 }
   0x8   :  { %241 = vmatprep.subr.mxu1 %v279_v1  ;;  %v214_v17 = vld [vmem:[%s360_s4] ss:$0 sm:$0xff]  ;;  %p258_p0 = scmp.ne.s32.totalorder %s205_s18, %s257_s2  ;;  %p263_p2 = scmp.lt.s32.totalorder %s257_s2, %s257_s2 }
   0x9   :  { %242 = vmatpush3.msra.mxu1 %v110_v7 }
   0xa   :  { %243 = vmatprep.subr.mxu1 %v279_v1  ;;  %p264_p3 = por %p263_p2, %p262_p1 }
   0xb   :  { %244 = vmatpush3.msra.mxu1 %v109_v8 }
   0xc   :  { %245 = vmatprep.subr.mxu1 %v279_v1  ;;  %p265_p4 = pnand %p264_p3, %p258_p0 }
   0xd   :  { %246 = vmatpush3.msra.mxu1 %v108_v9 }
   0xe   :  { %247 = vmatprep.subr.mxu1 %v279_v1 }
   0xf   :  { %248 = vmatpush3.msra.mxu1 %v107_v10 }
  0x10   :  { %249 = vmatprep.subr.mxu1 %v279_v1 }
  0x11   :  { %250 = vmatpush3.msra.mxu1 %v106_v11 }
  0xc5   :  { %v101_v13 = vpop.f32.mrf.mxu0 }
  0xc6   :  { %v102_v14 = vadd.f32 %v212_v12, %v101_v13 }
  0xc7   :  { %v234_v15 = vpop.f32.mrf.mxu0 }
  0xc8   :  { %v105_v16 = vmax.f32 %v102_v14, 0.0 }
  0xca   :  { %252 = vmatmul.mubr.msk.f32.vlgmr.msra.gmra.mxu1 %vm121_vm2, %v105_v16 }
 0x18a   :  { %v191_v18 = vpop.f32.mrf.mxu1 }
 0x18b   :  { %v192_v19 = vadd.f32 %v214_v17, %v191_v18 }
 0x18c   :  { %v253_v20 = vpop.f32.mrf.mxu1 }
 0x18d   :  { %v195_v21 = vmax.f32 %v192_v19, 0.0 }
 0x18f   :  { %197 = vst.msk [vmem:[#allocation2] sm:$0xff] %vm196_vm3, %v195_v21 }
 0x190   :  { %268 = shalt.err (!%p265_p4)
}
 0x191   :  { %207 = dma.vmem_to_hbm [thread:$0]  %s205_s18, 128, %s361_s5, [#allocation3]  }
 0x192   :  { %277 = dma.done.wait [#allocation3], 128  }
 0x193   :  { %278 = vsyncadd [#allocation3], 4294967168 }
 0x194   :  { %211 = vsyncpa [#allocation3], 1 }

</bundles_post_ra>
